<compile_context>
chip_gen: v6e
topology: v6e:2x2x1
jax: 0.10.0
libtpu: 0.0.40
codegen_flags: <defaults>
</compile_context>

<pallas_src>
import functools

import jax
import jax.numpy as jnp
from jax.experimental import pallas as pl
from jax.experimental.pallas import tpu as pltpu


def _round_up(x, m):
    return ((x + m - 1) // m) * m


def _mlp_kernel(x_ref, w1_ref, b1_ref, w2_ref, b2_ref, w3_ref, b3_ref, o_ref):
    # x_ref:  (TM, F)      bf16
    # w1_ref: (F, H1)      bf16    b1_ref: (1, H1)     f32
    # w2_ref: (H1, H2)     bf16    b2_ref: (1, H2)     f32
    # w3_ref: (H2, C_pad)  bf16    b3_ref: (1, C_pad)  f32
    # o_ref:  (TM, C_pad)  out_dtype
    x = x_ref[...]

    h1 = jnp.dot(x, w1_ref[...], preferred_element_type=jnp.float32) + b1_ref[...]
    h1 = jnp.maximum(h1, 0.0)

    h2 = jnp.dot(h1.astype(jnp.bfloat16), w2_ref[...],
                 preferred_element_type=jnp.float32) + b2_ref[...]
    h2 = jnp.maximum(h2, 0.0)

    out = jnp.dot(h2.astype(jnp.bfloat16), w3_ref[...],
                  preferred_element_type=jnp.float32) + b3_ref[...]
    o_ref[...] = out.astype(o_ref.dtype)


def prepare_params(w1, b1, w2, b2, w3, b3):
    """One-time parameter prep (hoisted out of the per-call hot path).

    Weights -> bf16 (in, out) layout; biases -> f32 (1, N) rows; the class dim
    of the final layer is zero-padded to a lane-dense multiple of 128 so the
    kernel's stores are unmasked.  Returns (params_tuple, num_classes).
    """
    H1 = w1.shape[1]
    H2 = w2.shape[1]
    C = w3.shape[1]
    C_pad = _round_up(C, 128)

    w1b = w1.astype(jnp.bfloat16)
    w2b = w2.astype(jnp.bfloat16)
    w3b = jnp.zeros((H2, C_pad), jnp.bfloat16).at[:, :C].set(w3.astype(jnp.bfloat16))
    b1r = b1.reshape(1, H1).astype(jnp.float32)
    b2r = b2.reshape(1, H2).astype(jnp.float32)
    b3r = jnp.zeros((1, C_pad), jnp.float32).at[:, :C].set(b3.astype(jnp.float32))
    params = (w1b, b1r, w2b, b2r, w3b, b3r)
    return jax.tree_util.tree_map(jnp.asarray, params), C


@functools.partial(jax.jit, static_argnames=("num_classes", "tm", "out_dtype"))
def two_layer_mlp_forward(x, params, *, num_classes, tm=None, out_dtype=jnp.float32):
    """Fused forward pass.  x: (B, C, H, W) or already-flat (B, F).

    params: output of prepare_params (pre-cast bf16 weights, padded classes).
    tm: batch-tile rows per grid step.  Default heuristic:
        min(512, round_up(B, 16)) -- tiny batches pad only to the bf16 sublane
        pack, large batches use 512-row tiles (fills the 256-wide v6e/v7x MXU
        and gives >=2 "parallel" grid steps for v7x's 2 TensorCores).  On v5e
        tm=128 is equally good for the MXU; pass it explicitly if desired.
    """
    w1b, b1r, w2b, b2r, w3b, b3r = params

    if x.ndim > 2:
        x = x.reshape(x.shape[0], -1)            # nn.Flatten(start_dim=1)
    B, F = x.shape
    H1 = w1b.shape[1]
    H2 = w2b.shape[1]
    C_pad = w3b.shape[1]

    if tm is None:
        tm = min(512, _round_up(B, 16))
    B_pad = _round_up(B, tm)

    xb = x.astype(jnp.bfloat16)
    if B_pad != B:
        # Tiny zero pad (e.g. 2 -> 16 rows); padded rows are sliced off below.
        xb = jnp.zeros((B_pad, F), jnp.bfloat16).at[:B].set(xb)

    grid = (B_pad // tm,)

    out_itemsize = jnp.dtype(out_dtype).itemsize
    flops = 2 * B_pad * (F * H1 + H1 * H2 + H2 * C_pad)
    bytes_accessed = (
        B_pad * F * 2                                    # x (bf16)
        + (F * H1 + H1 * H2 + H2 * C_pad) * 2            # weights (bf16)
        + (H1 + H2 + C_pad) * 4                          # biases (f32)
        + B_pad * C_pad * out_itemsize                   # out
    )

    out = pl.pallas_call(
        _mlp_kernel,
        out_shape=jax.ShapeDtypeStruct((B_pad, C_pad), out_dtype),
        grid_spec=pl.GridSpec(
            grid=grid,
            in_specs=[
                # x streams per batch tile ...
                pl.BlockSpec((tm, F), lambda i: (i, 0)),
                # ... weights/biases use a constant index_map -> fetched once,
                # VMEM-resident across all grid steps.
                pl.BlockSpec((F, H1), lambda i: (0, 0)),
                pl.BlockSpec((1, H1), lambda i: (0, 0)),
                pl.BlockSpec((H1, H2), lambda i: (0, 0)),
                pl.BlockSpec((1, H2), lambda i: (0, 0)),
                pl.BlockSpec((H2, C_pad), lambda i: (0, 0)),
                pl.BlockSpec((1, C_pad), lambda i: (0, 0)),
            ],
            out_specs=pl.BlockSpec((tm, C_pad), lambda i: (i, 0)),
        ),
        compiler_params=pltpu.CompilerParams(
            dimension_semantics=("parallel",),   # batch tiles shard across v7x's 2 TCs
        ),
        cost_estimate=pl.CostEstimate(
            flops=flops, transcendentals=0, bytes_accessed=bytes_accessed),
    )(xb, w1b, b1r, w2b, b2r, w3b, b3r)

    return out[:B, :num_classes]


def _init_linear(key, fan_in, fan_out):
    # Deterministic init mimicking PyTorch's nn.Linear default:
    # U(-1/sqrt(fan_in), 1/sqrt(fan_in)) for both weight and bias.
    kw, kb = jax.random.split(key)
    bound = 1.0 / jnp.sqrt(fan_in)
    w = jax.random.uniform(kw, (fan_in, fan_out), jnp.float32, -bound, bound)
    b = jax.random.uniform(kb, (fan_out,), jnp.float32, -bound, bound)
    return w, b


if __name__ == "__main__":
    # Shapes consistent with the module: image-like input flattened to features.
    B, Cin, H, W = 2, 4, 16, 16
    num_features = Cin * H * W      # 1024
    hidden_dim1 = 128
    hidden_dim2 = 64
    num_classes = 16

    key = jax.random.PRNGKey(0)
    kx, k1, k2, k3 = jax.random.split(key, 4)

    x = jax.random.normal(kx, (B, Cin, H, W), jnp.float32)
    w1, b1 = _init_linear(k1, num_features, hidden_dim1)
    w2, b2 = _init_linear(k2, hidden_dim1, hidden_dim2)
    w3, b3 = _init_linear(k3, hidden_dim2, num_classes)

    # One-time param prep (outside the hot path).
    params, n_classes = prepare_params(w1, b1, w2, b2, w3, b3)
    params = jax.block_until_ready(params)

    out = two_layer_mlp_forward(x, params, num_classes=n_classes)
    out = jax.block_until_ready(out)
    assert out.shape == (B, num_classes)

    # Pure-JAX reference using the same bf16-input / f32-accumulate precision
    # path as the kernel (tight tolerance).
    xf = x.reshape(B, -1)
    xb = xf.astype(jnp.bfloat16)
    r1 = jnp.maximum(
        jnp.dot(xb, w1.astype(jnp.bfloat16), preferred_element_type=jnp.float32) + b1, 0.0)
    r2 = jnp.maximum(
        jnp.dot(r1.astype(jnp.bfloat16), w2.astype(jnp.bfloat16),
                preferred_element_type=jnp.float32) + b2, 0.0)
    ref_bf16 = jnp.dot(r2.astype(jnp.bfloat16), w3.astype(jnp.bfloat16),
                       preferred_element_type=jnp.float32) + b3
    assert jnp.allclose(out, ref_bf16, atol=1e-3, rtol=1e-3)

    # Loose sanity check against full-f32 math (PyTorch-equivalent forward).
    ref_f32 = jnp.maximum(xf @ w1 + b1, 0.0)
    ref_f32 = jnp.maximum(ref_f32 @ w2 + b2, 0.0)
    ref_f32 = ref_f32 @ w3 + b3
    assert jnp.allclose(out, ref_f32, atol=1e-1, rtol=1e-1)

    print("KERNEL_OK")
</pallas_src>

<mosaic_0001>
module attributes {stable_mosaic.version = 11 : i64} {
  func.func @_mlp_kernel(%arg0: i32, %arg1: memref<16x1024xbf16, #tpu.memory_space<vmem>>, %arg2: memref<1024x128xbf16, #tpu.memory_space<vmem>>, %arg3: memref<1x128xf32, #tpu.memory_space<vmem>>, %arg4: memref<128x64xbf16, #tpu.memory_space<vmem>>, %arg5: memref<1x64xf32, #tpu.memory_space<vmem>>, %arg6: memref<64x128xbf16, #tpu.memory_space<vmem>>, %arg7: memref<1x128xf32, #tpu.memory_space<vmem>>, %arg8: memref<16x128xf32, #tpu.memory_space<vmem>>) attributes {dimension_semantics = [#tpu.dimension_semantics<parallel>], iteration_bounds = array<i64: 1>, scalar_prefetch = 0 : i64, scratch_operands = 0 : i64, tpu.core_type = #tpu.core_type<tc>, window_params = [{transform_indices = @transform_0, window_bounds = array<i64: 16, 1024>}, {pipeline_mode = #tpu.pipeline_mode<synchronous>, transform_indices = @transform_1, window_bounds = array<i64: 1024, 128>}, {pipeline_mode = #tpu.pipeline_mode<synchronous>, transform_indices = @transform_2, window_bounds = array<i64: 1, 128>}, {pipeline_mode = #tpu.pipeline_mode<synchronous>, transform_indices = @transform_3, window_bounds = array<i64: 128, 64>}, {pipeline_mode = #tpu.pipeline_mode<synchronous>, transform_indices = @transform_4, window_bounds = array<i64: 1, 64>}, {pipeline_mode = #tpu.pipeline_mode<synchronous>, transform_indices = @transform_5, window_bounds = array<i64: 64, 128>}, {pipeline_mode = #tpu.pipeline_mode<synchronous>, transform_indices = @transform_6, window_bounds = array<i64: 1, 128>}, {transform_indices = @transform_7, window_bounds = array<i64: 16, 128>}]} {
    %c0 = arith.constant 0 : index
    %c0_0 = arith.constant 0 : index
    %0 = vector.load %arg1[%c0, %c0_0] : memref<16x1024xbf16, #tpu.memory_space<vmem>>, vector<16x1024xbf16>
    %c0_1 = arith.constant 0 : index
    %c0_2 = arith.constant 0 : index
    %1 = vector.load %arg2[%c0_1, %c0_2] : memref<1024x128xbf16, #tpu.memory_space<vmem>>, vector<1024x128xbf16>
    %cst = arith.constant dense<0.000000e+00> : vector<16x128xf32>
    %2 = tpu.matmul %0, %1, %cst {dimension_numbers = #tpu.dot_dimension_numbers<[1], [0], [0], [1], [0, 0, 1, 1], [], []>} : vector<16x1024xbf16>, vector<1024x128xbf16>, vector<16x128xf32> -> vector<16x128xf32>
    %c0_3 = arith.constant 0 : index
    %c0_4 = arith.constant 0 : index
    %3 = vector.load %arg3[%c0_3, %c0_4] : memref<1x128xf32, #tpu.memory_space<vmem>>, vector<1x128xf32>
    %4 = vector.broadcast %3 : vector<1x128xf32> to vector<16x128xf32>
    %5 = arith.addf %2, %4 : vector<16x128xf32>
    %cst_5 = arith.constant 0.000000e+00 : f32
    %6 = vector.broadcast %cst_5 : f32 to vector<16x128xf32>
    %7 = arith.maximumf %5, %6 : vector<16x128xf32>
    %8 = arith.truncf %7 : vector<16x128xf32> to vector<16x128xbf16>
    %c0_6 = arith.constant 0 : index
    %c0_7 = arith.constant 0 : index
    %9 = vector.load %arg4[%c0_6, %c0_7] : memref<128x64xbf16, #tpu.memory_space<vmem>>, vector<128x64xbf16>
    %cst_8 = arith.constant dense<0.000000e+00> : vector<16x64xf32>
    %10 = tpu.matmul %8, %9, %cst_8 {dimension_numbers = #tpu.dot_dimension_numbers<[1], [0], [0], [1], [0, 0, 1, 1], [], []>} : vector<16x128xbf16>, vector<128x64xbf16>, vector<16x64xf32> -> vector<16x64xf32>
    %c0_9 = arith.constant 0 : index
    %c0_10 = arith.constant 0 : index
    %11 = vector.load %arg5[%c0_9, %c0_10] : memref<1x64xf32, #tpu.memory_space<vmem>>, vector<1x64xf32>
    %12 = vector.broadcast %11 : vector<1x64xf32> to vector<16x64xf32>
    %13 = arith.addf %10, %12 : vector<16x64xf32>
    %cst_11 = arith.constant 0.000000e+00 : f32
    %14 = vector.broadcast %cst_11 : f32 to vector<16x64xf32>
    %15 = arith.maximumf %13, %14 : vector<16x64xf32>
    %16 = arith.truncf %15 : vector<16x64xf32> to vector<16x64xbf16>
    %c0_12 = arith.constant 0 : index
    %c0_13 = arith.constant 0 : index
    %17 = vector.load %arg6[%c0_12, %c0_13] : memref<64x128xbf16, #tpu.memory_space<vmem>>, vector<64x128xbf16>
    %cst_14 = arith.constant dense<0.000000e+00> : vector<16x128xf32>
    %18 = tpu.matmul %16, %17, %cst_14 {dimension_numbers = #tpu.dot_dimension_numbers<[1], [0], [0], [1], [0, 0, 1, 1], [], []>} : vector<16x64xbf16>, vector<64x128xbf16>, vector<16x128xf32> -> vector<16x128xf32>
    %c0_15 = arith.constant 0 : index
    %c0_16 = arith.constant 0 : index
    %19 = vector.load %arg7[%c0_15, %c0_16] : memref<1x128xf32, #tpu.memory_space<vmem>>, vector<1x128xf32>
    %20 = vector.broadcast %19 : vector<1x128xf32> to vector<16x128xf32>
    %21 = arith.addf %18, %20 : vector<16x128xf32>
    %c0_17 = arith.constant 0 : index
    %c0_18 = arith.constant 0 : index
    %22 = vector.load %arg8[%c0_17, %c0_18] : memref<16x128xf32, #tpu.memory_space<vmem>>, vector<16x128xf32>
    tpu.vector_store %arg8[%c0_17, %c0_18], %21 {strides = array<i32>} : memref<16x128xf32, #tpu.memory_space<vmem>>, vector<16x128xf32>,
    return
  }
  func.func @transform_0(%arg0: i32) -> (i32, i32) {
    %c0_i32 = arith.constant 0 : i32
    %c0_i32_0 = arith.constant 0 : i32
    return %arg0, %c0_i32 : i32, i32
  }
  func.func @transform_1(%arg0: i32) -> (i32, i32) {
    %c0_i32 = arith.constant 0 : i32
    %c0_i32_0 = arith.constant 0 : i32
    %c0_i32_1 = arith.constant 0 : i32
    return %c0_i32, %c0_i32_0 : i32, i32
  }
  func.func @transform_2(%arg0: i32) -> (i32, i32) {
    %c0_i32 = arith.constant 0 : i32
    %c0_i32_0 = arith.constant 0 : i32
    %c0_i32_1 = arith.constant 0 : i32
    return %c0_i32, %c0_i32_0 : i32, i32
  }
  func.func @transform_3(%arg0: i32) -> (i32, i32) {
    %c0_i32 = arith.constant 0 : i32
    %c0_i32_0 = arith.constant 0 : i32
    %c0_i32_1 = arith.constant 0 : i32
    return %c0_i32, %c0_i32_0 : i32, i32
  }
  func.func @transform_4(%arg0: i32) -> (i32, i32) {
    %c0_i32 = arith.constant 0 : i32
    %c0_i32_0 = arith.constant 0 : i32
    %c0_i32_1 = arith.constant 0 : i32
    return %c0_i32, %c0_i32_0 : i32, i32
  }
  func.func @transform_5(%arg0: i32) -> (i32, i32) {
    %c0_i32 = arith.constant 0 : i32
    %c0_i32_0 = arith.constant 0 : i32
    %c0_i32_1 = arith.constant 0 : i32
    return %c0_i32, %c0_i32_0 : i32, i32
  }
  func.func @transform_6(%arg0: i32) -> (i32, i32) {
    %c0_i32 = arith.constant 0 : i32
    %c0_i32_0 = arith.constant 0 : i32
    %c0_i32_1 = arith.constant 0 : i32
    return %c0_i32, %c0_i32_0 : i32, i32
  }
  func.func @transform_7(%arg0: i32) -> (i32, i32) {
    %c0_i32 = arith.constant 0 : i32
    %c0_i32_0 = arith.constant 0 : i32
    return %arg0, %c0_i32 : i32, i32
  }
}

</mosaic_0001>

<bundles_post_ra>
// kernel: two_layer_mlp_forward.1
= control target key start
LH: loop header
LB: loop body
LE: loop exit
PB: predicated region body
PF: predicated region fallthrough
CT: control target
= control target key end

     0   :  { %12 = vsyncpa [#allocation3], 0  ;;  %s1306_s24 = smov [#allocation2]   ;;  %s1443_s0 = inlined_call_operand.vmem [shape: bf16[16,1024], index: 0, kind: input, shape index: {}]   ;;  %s1444_s1 = inlined_call_operand.hbm [shape: bf16[1024,128], index: 1, kind: input, shape index: {}]   ;;  %s1445_s2 = inlined_call_operand.vmem [shape: f32[1,128], index: 2, kind: input, shape index: {}]   ;;  %s1446_s3 = inlined_call_operand.vmem [shape: bf16[128,64], index: 3, kind: input, shape index: {}]   ;;  %s1447_s4 = inlined_call_operand.vmem [shape: f32[1,64], index: 4, kind: input, shape index: {}]   ;;  %s1448_s5 = inlined_call_operand.vmem [shape: bf16[64,128], index: 5, kind: input, shape index: {}]   ;;  %s1449_s6 = inlined_call_operand.vmem [shape: f32[1,128], index: 6, kind: input, shape index: {}]   ;;  %s1450_s7 = inlined_call_operand.vmem [shape: f32[16,128], index: 7, kind: output, shape index: {}]  }
   0x1   :  { %s20_s25 = sshll.u32 %s1306_s24, 4  ;;  %s21_s25 = int_to_ptr.vmem [resolvable:$true] %s20_s25 }
   0x2   :  { %s1292_s26 = scalar_lea.vmem %s21_s25, 8192  ;;  %p1297_p1 = scmp.lt.s32.totalorder %s21_s25, %s21_s25 }
   0x3   :  { %p1293_p0 = scmp.ne.s32.totalorder %s21_s25, %s1292_s26  ;;  %p1298_p2 = scmp.lt.s32.totalorder %s1292_s26, %s1292_s26 }
   0x5   :  { %p1299_p3 = por %p1298_p2, %p1297_p1 }
   0x7   :  { %p1300_p4 = pnand %p1299_p3, %p1293_p0 }
   0x9   :  { %1303 = shalt.err (!%p1300_p4)
}
   0xa   :  { %s1307_s27 = smov 64   ;;  %s1308_s28 = smov 4  }
   0xb   :  { %26 = dma.hbm_to_vmem [thread:$0]  %s1444_s1, 8192, %s21_s25, [#allocation3], %s1307_s27, %s1307_s27, %s1308_s28  }
   0xc   :  { %1304 = dma.done.wait [#allocation3], 8192  }
   0xd   :  { %1305 = vsyncadd [#allocation3], 4294959104  ;;  %v1208_v0 = vld [vmem:[#allocation2 + $0x78] sm:$0xff]   ;;  %v1212_v4 = vld [vmem:[#allocation2 + $0x70] sm:$0xff]   ;;  %vm1310_vm0 = vmmov 0   ;;  %vm929_vm1 = vcmask 523264  }
   0xe   :  { %v1209_v1 = vld [vmem:[#allocation2 + $0xf8] sm:$0xff]   ;;  %1069 = vmatprep.subr.bf16.mxu0 %v1208_v0  ;;  %v1213_v5 = vld [vmem:[#allocation2 + $0xf0] sm:$0xff]   ;;  %v1216_v8 = vld [vmem:[#allocation2 + $0x68] sm:$0xff]  }
   0xf   :  { %v1210_v2 = vld [vmem:[#allocation2 + $0x38] sm:$0xff]   ;;  %1091 = vmatprep.subr.bf16.mxu1 %v1209_v1  ;;  %v1214_v6 = vld [vmem:[#allocation2 + $0x30] sm:$0xff]   ;;  %v1217_v9 = vld [vmem:[#allocation2 + $0xe8] sm:$0xff]  }
  0x10   :  { %v1211_v3 = vld [vmem:[#allocation2 + $0xb8] sm:$0xff]   ;;  %1070 = vmatpush3.bf16.msra.mxu0 %v1210_v2  ;;  %v1215_v7 = vld [vmem:[#allocation2 + $0xb0] sm:$0xff]   ;;  %v1218_v10 = vld [vmem:[#allocation2 + $0x28] sm:$0xff]  }
  0x11   :  { %1092 = vmatpush3.bf16.msra.mxu1 %v1211_v3  ;;  %1071 = vmatprep.subr.bf16.mxu0 %v1212_v4  ;;  %v1219_v11 = vld [vmem:[#allocation2 + $0xa8] sm:$0xff]   ;;  %v1220_v12 = vld [vmem:[#allocation2 + $0x60] sm:$0xff]   ;;  %v1224_v16 = vld [vmem:[#allocation2 + $0x58] sm:$0xff]  }
  0x12   :  { %1093 = vmatprep.subr.bf16.mxu1 %v1213_v5  ;;  %v1221_v13 = vld [vmem:[#allocation2 + $0xe0] sm:$0xff]   ;;  %v1225_v17 = vld [vmem:[#allocation2 + $0xd8] sm:$0xff]   ;;  %v1228_v20 = vld [vmem:[#allocation2 + $0x50] sm:$0xff]  }
  0x13   :  { %v1222_v14 = vld [vmem:[#allocation2 + $0x20] sm:$0xff]   ;;  %v1226_v18 = vld [vmem:[#allocation2 + $0x18] sm:$0xff]   ;;  %v1229_v21 = vld [vmem:[#allocation2 + $0xd0] sm:$0xff]  }
  0x14   :  { %1072 = vmatpush3.bf16.msra.mxu0 %v1214_v6  ;;  %v1223_v15 = vld [vmem:[#allocation2 + $0xa0] sm:$0xff]   ;;  %v1227_v19 = vld [vmem:[#allocation2 + $0x98] sm:$0xff]   ;;  %v1230_v22 = vld [vmem:[#allocation2 + $0x10] sm:$0xff]  }
  0x15   :  { %1094 = vmatpush3.bf16.msra.mxu1 %v1215_v7  ;;  %1073 = vmatprep.subr.bf16.mxu0 %v1216_v8  ;;  %v1231_v23 = vld [vmem:[#allocation2 + $0x90] sm:$0xff]   ;;  %v1232_v24 = vld [vmem:[#allocation2 + $0x48] sm:$0xff]   ;;  %v1236_v28 = vld [vmem:[#allocation2 + $0x40] sm:$0xff]  }
  0x16   :  { %1095 = vmatprep.subr.bf16.mxu1 %v1217_v9  ;;  %v1233_v25 = vld [vmem:[#allocation2 + $0xc8] sm:$0xff]   ;;  %v1237_v29 = vld [vmem:[#allocation2 + $0xc0] sm:$0xff]   ;;  %v1240_v40 = vld [vmem:[#allocation2 + $0x178] sm:$0xff]  }
  0x17   :  { %v1234_v26 = vld [vmem:[#allocation2 + $0x8] sm:$0xff]   ;;  %v1238_v30 = vld [vmem:[#allocation2] sm:$0xff]   ;;  %v1241_v41 = vld [vmem:[#allocation2 + $0x1f8] sm:$0xff]  }
  0x18   :  { %1074 = vmatpush3.bf16.msra.mxu0 %v1218_v10  ;;  %v1235_v27 = vld [vmem:[#allocation2 + $0x88] sm:$0xff]   ;;  %v1239_v31 = vld [vmem:[#allocation2 + $0x80] sm:$0xff]   ;;  %v1242_v42 = vld [vmem:[#allocation2 + $0x138] sm:$0xff]  }
  0x19   :  { %1096 = vmatpush3.bf16.msra.mxu1 %v1219_v11  ;;  %1075 = vmatprep.subr.bf16.mxu0 %v1220_v12  ;;  %v41_v32 = vld [vmem:[%s1443_s0] sm:$0xff]  ;;  %v42_v34 = vld [vmem:[%s1443_s0 + $0x8] sm:$0xff]  ;;  %v1243_v43 = vld [vmem:[#allocation2 + $0x1b8] sm:$0xff]  }
  0x1a   :  { %1097 = vmatprep.subr.bf16.mxu1 %v1221_v13  ;;  %v45_v33 = vld [vmem:[%s1443_s0 + $0x20] sm:$0xff]  ;;  %v46_v37 = vld [vmem:[%s1443_s0 + $0x28] sm:$0xff]  ;;  %v1244_v44 = vld [vmem:[#allocation2 + $0x170] sm:$0xff]  }
  0x1b   :  { %v982_v35 = vcombine.low %v41_v32, %v45_v33  ;;  %v983_v36 = vcombine.high %v41_v32, %v45_v33  ;;  %v984_v38 = vcombine.low %v42_v34, %v46_v37  ;;  %v985_v39 = vcombine.high %v42_v34, %v46_v37  ;;  %v1245_v45 = vld [vmem:[#allocation2 + $0x1f0] sm:$0xff]   ;;  %v1248_v48 = vld [vmem:[#allocation2 + $0x168] sm:$0xff]   ;;  %v1252_v52 = vld [vmem:[#allocation2 + $0x160] sm:$0xff]  }
  0x1c   :  { %1076 = vmatpush3.bf16.msra.mxu0 %v1222_v14  ;;  %v1246_v46 = vld [vmem:[#allocation2 + $0x130] sm:$0xff]   ;;  %v1249_v49 = vld [vmem:[#allocation2 + $0x1e8] sm:$0xff]   ;;  %v1253_v53 = vld [vmem:[#allocation2 + $0x1e0] sm:$0xff]  }
  0x1d   :  { %1098 = vmatpush3.bf16.msra.mxu1 %v1223_v15  ;;  %1077 = vmatprep.subr.bf16.mxu0 %v1224_v16  ;;  %v1247_v47 = vld [vmem:[#allocation2 + $0x1b0] sm:$0xff]   ;;  %v1250_v50 = vld [vmem:[#allocation2 + $0x128] sm:$0xff]   ;;  %v1254_v54 = vld [vmem:[#allocation2 + $0x120] sm:$0xff]  }
  0x1e   :  { %1099 = vmatprep.subr.bf16.mxu1 %v1225_v17  ;;  %640 = vmatprep.mubr.bf16.mxu0 %v983_v36  ;;  %v1251_v51 = vld [vmem:[#allocation2 + $0x1a8] sm:$0xff]   ;;  %v1255_v55 = vld [vmem:[#allocation2 + $0x1a0] sm:$0xff]   ;;  %v1256_v56 = vld [vmem:[#allocation2 + $0x158] sm:$0xff]   ;;  %v1309_v17 = vmov 0.0  }
  0x1f   :  { %681 = vmatprep.mubr.bf16.mxu1 %v985_v39  ;;  %v1257_v57 = vld [vmem:[#allocation2 + $0x1d8] sm:$0xff]   ;;  %v1260_v60 = vld [vmem:[#allocation2 + $0x150] sm:$0xff]   ;;  %v1264_v0 = vld [vmem:[#allocation2 + $0x148] sm:$0xff]  }
  0x20   :  { %1078 = vmatpush3.bf16.msra.mxu0 %v1226_v18  ;;  %v1258_v58 = vld [vmem:[#allocation2 + $0x118] sm:$0xff]   ;;  %v1261_v61 = vld [vmem:[#allocation2 + $0x1d0] sm:$0xff]   ;;  %v1265_v1 = vld [vmem:[#allocation2 + $0x1c8] sm:$0xff]  }
  0x21   :  { %1100 = vmatpush3.bf16.msra.mxu1 %v1227_v19  ;;  %1079 = vmatprep.subr.bf16.mxu0 %v1228_v20  ;;  %v1259_v59 = vld [vmem:[#allocation2 + $0x198] sm:$0xff]   ;;  %v1262_v62 = vld [vmem:[#allocation2 + $0x110] sm:$0xff]   ;;  %v1266_v2 = vld [vmem:[#allocation2 + $0x108] sm:$0xff]  }
  0x22   :  { %1101 = vmatprep.subr.bf16.mxu1 %v1229_v21  ;;  %v1263_v63 = vld [vmem:[#allocation2 + $0x190] sm:$0xff]   ;;  %v1267_v3 = vld [vmem:[#allocation2 + $0x188] sm:$0xff]   ;;  %v1268_v4 = vld [vmem:[#allocation2 + $0x140] sm:$0xff]  }
  0x23   :  { %v1269_v5 = vld [vmem:[#allocation2 + $0x1c0] sm:$0xff]   ;;  %v43_v8 = vld [vmem:[%s1443_s0 + $0x10] sm:$0xff]  ;;  %v44_v12 = vld [vmem:[%s1443_s0 + $0x18] sm:$0xff] }
  0x24   :  { %1080 = vmatpush3.bf16.msra.mxu0 %v1230_v22  ;;  %v1270_v6 = vld [vmem:[#allocation2 + $0x100] sm:$0xff]   ;;  %v47_v9 = vld [vmem:[%s1443_s0 + $0x30] sm:$0xff]  ;;  %v48_v13 = vld [vmem:[%s1443_s0 + $0x38] sm:$0xff] }
  0x25   :  { %1102 = vmatpush3.bf16.msra.mxu1 %v1231_v23  ;;  %1081 = vmatprep.subr.bf16.mxu0 %v1232_v24  ;;  %v1271_v7 = vld [vmem:[#allocation2 + $0x180] sm:$0xff]   ;;  %v986_v10 = vcombine.low %v43_v8, %v47_v9  ;;  %v987_v11 = vcombine.high %v43_v8, %v47_v9  ;;  %v988_v14 = vcombine.low %v44_v12, %v48_v13  ;;  %v1272_v16 = vld [vmem:[%s1446_s3 + $0x38] sm:$0xff]   ;;  %v1273_v18 = vld [vmem:[%s1446_s3 + $0x30] sm:$0xff]  }
  0x26   :  { %1103 = vmatprep.subr.bf16.mxu1 %v1233_v25  ;;  %v989_v15 = vcombine.high %v44_v12, %v48_v13  ;;  %v1274_v19 = vld [vmem:[%s1446_s3 + $0x28] sm:$0xff]   ;;  %v1275_v20 = vld [vmem:[%s1446_s3 + $0x20] sm:$0xff]   ;;  %v1276_v21 = vld [vmem:[%s1446_s3 + $0x18] sm:$0xff]  }
  0x27   :  { %v1277_v22 = vld [vmem:[%s1446_s3 + $0x10] sm:$0xff]   ;;  %v1278_v23 = vld [vmem:[%s1446_s3 + $0x8] sm:$0xff]   ;;  %v1279_v24 = vld [vmem:[%s1446_s3] sm:$0xff]  }
  0x28   :  { %1082 = vmatpush3.bf16.msra.mxu0 %v1234_v26  ;;  %v1280_v25 = vld [vmem:[%s1448_s5 + $0x18] sm:$0xff]   ;;  %v981_v33 = vld [vmem:[%s1445_s2] ss:$0 sm:$0xff] }
  0x29   :  { %1104 = vmatpush3.bf16.msra.mxu1 %v1235_v27  ;;  %1083 = vmatprep.subr.bf16.mxu0 %v1236_v28 }
  0x2a   :  { %1105 = vmatprep.subr.bf16.mxu1 %v1237_v29 }
  0x2c   :  { %1084 = vmatpush3.bf16.msra.mxu0 %v1238_v30 }
  0x2d   :  { %1106 = vmatpush3.bf16.msra.mxu1 %v1239_v31  ;;  %1113 = vmatprep.subr.bf16.mxu0 %v1240_v40 }
  0x2e   :  { %1135 = vmatprep.subr.bf16.mxu1 %v1241_v41 }
  0x2f   :  { %641 = vmatmul.mubr.bf16.vlgmr.msra.gmra.mxu0 %v982_v35 }
  0x30   :  { %682 = vmatmul.mubr.bf16.vlgmr.msra.gmra.mxu1 %v984_v38  ;;  %1114 = vmatpush3.bf16.msra.mxu0 %v1242_v42 }
  0x31   :  { %1136 = vmatpush3.bf16.msra.mxu1 %v1243_v43  ;;  %1115 = vmatprep.subr.bf16.mxu0 %v1244_v44 }
  0x32   :  { %1137 = vmatprep.subr.bf16.mxu1 %v1245_v45  ;;  %722 = vmatprep.mubr.bf16.mxu0 %v987_v11  ;;  %v1063_v11 = vld [vmem:[%s1449_s6] ss:$0 sm:$0xff] }
  0x33   :  { %763 = vmatprep.mubr.bf16.mxu1 %v989_v15 }
  0x34   :  { %1116 = vmatpush3.bf16.msra.mxu0 %v1246_v46 }
  0x35   :  { %1138 = vmatpush3.bf16.msra.mxu1 %v1247_v47  ;;  %1117 = vmatprep.subr.bf16.mxu0 %v1248_v48 }
  0x36   :  { %1139 = vmatprep.subr.bf16.mxu1 %v1249_v49 }
  0x38   :  { %1118 = vmatpush3.bf16.msra.mxu0 %v1250_v50 }
  0x39   :  { %1140 = vmatpush3.bf16.msra.mxu1 %v1251_v51  ;;  %1119 = vmatprep.subr.bf16.mxu0 %v1252_v52 }
  0x3a   :  { %1141 = vmatprep.subr.bf16.mxu1 %v1253_v53 }
  0x3c   :  { %1120 = vmatpush3.bf16.msra.mxu0 %v1254_v54 }
  0x3d   :  { %1142 = vmatpush3.bf16.msra.mxu1 %v1255_v55  ;;  %1121 = vmatprep.subr.bf16.mxu0 %v1256_v56 }
  0x3e   :  { %1143 = vmatprep.subr.bf16.mxu1 %v1257_v57 }
  0x40   :  { %1122 = vmatpush3.bf16.msra.mxu0 %v1258_v58 }
  0x41   :  { %1144 = vmatpush3.bf16.msra.mxu1 %v1259_v59  ;;  %1123 = vmatprep.subr.bf16.mxu0 %v1260_v60 }
  0x42   :  { %1145 = vmatprep.subr.bf16.mxu1 %v1261_v61 }
  0x44   :  { %1124 = vmatpush3.bf16.msra.mxu0 %v1262_v62  ;;  %v1281_v62 = vld [vmem:[%s1448_s5 + $0x10] sm:$0xff]  }
  0x45   :  { %1146 = vmatpush3.bf16.msra.mxu1 %v1263_v63  ;;  %1125 = vmatprep.subr.bf16.mxu0 %v1264_v0  ;;  %v1282_v63 = vld [vmem:[%s1448_s5 + $0x8] sm:$0xff]   ;;  %v1283_v0 = vld [vmem:[%s1448_s5] sm:$0xff]  }
  0x46   :  { %1147 = vmatprep.subr.bf16.mxu1 %v1265_v1  ;;  %v1054_v1 = vld [vmem:[%s1447_s4] ss:$0 sm:$0xff] }
  0x48   :  { %1126 = vmatpush3.bf16.msra.mxu0 %v1266_v2 }
  0x49   :  { %1148 = vmatpush3.bf16.msra.mxu1 %v1267_v3  ;;  %1127 = vmatprep.subr.bf16.mxu0 %v1268_v4 }
  0x4a   :  { %1149 = vmatprep.subr.bf16.mxu1 %v1269_v5 }
  0x4c   :  { %1128 = vmatpush3.bf16.msra.mxu0 %v1270_v6 }
  0x4d   :  { %1150 = vmatpush3.bf16.msra.mxu1 %v1271_v7  ;;  %1171 = vmatprep.subr.bf16.mxu0 %v1309_v17 }
  0x4e   :  { %1191 = vmatprep.subr.bf16.mxu1 %v1309_v17 }
  0x4f   :  { %723 = vmatmul.mubr.bf16.vlgmr.msra.gmra.mxu0 %v986_v10 }
  0x50   :  { %764 = vmatmul.mubr.bf16.vlgmr.msra.gmra.mxu1 %v988_v14  ;;  %1172 = vmatpush3.bf16.msra.mxu0 %v1272_v16 }
  0x51   :  { %1173 = vmatprep.subr.bf16.mxu0 %v1309_v17  ;;  %1187 = vmatprep.mubr.msk.bf16.mxu0 %vm1310_vm0, %v1309_v17 }
  0x52   :  { %1199 = vmatprep.mubr.msk.bf16.mxu1 %vm1310_vm0, %v1309_v17  ;;  %1192 = vmatpush3.bf16.msra.mxu1 %v1280_v25 }
  0x53   :  { %1193 = vmatprep.subr.bf16.mxu1 %v1309_v17 }
  0x54   :  { %1174 = vmatpush3.bf16.msra.mxu0 %v1273_v18 }
  0x55   :  { %1175 = vmatprep.subr.bf16.mxu0 %v1309_v17 }
  0x56   :  { %1194 = vmatpush3.bf16.msra.mxu1 %v1281_v62 }
  0x57   :  { %1195 = vmatprep.subr.bf16.mxu1 %v1309_v17 }
  0x58   :  { %1176 = vmatpush3.bf16.msra.mxu0 %v1274_v19 }
  0x59   :  { %1177 = vmatprep.subr.bf16.mxu0 %v1309_v17 }
  0x5a   :  { %1196 = vmatpush3.bf16.msra.mxu1 %v1282_v63 }
  0x5b   :  { %1197 = vmatprep.subr.bf16.mxu1 %v1309_v17 }
  0x5c   :  { %1178 = vmatpush3.bf16.msra.mxu0 %v1275_v20 }
  0x5d   :  { %1179 = vmatprep.subr.bf16.mxu0 %v1309_v17 }
  0x5e   :  { %1198 = vmatpush3.bf16.msra.mxu1 %v1283_v0 }
  0x60   :  { %1180 = vmatpush3.bf16.msra.mxu0 %v1276_v21 }
  0x61   :  { %1181 = vmatprep.subr.bf16.mxu0 %v1309_v17 }
  0x64   :  { %1182 = vmatpush3.bf16.msra.mxu0 %v1277_v22 }
  0x65   :  { %1183 = vmatprep.subr.bf16.mxu0 %v1309_v17 }
  0x68   :  { %1184 = vmatpush3.bf16.msra.mxu0 %v1278_v23 }
  0x69   :  { %1185 = vmatprep.subr.bf16.mxu0 %v1309_v17 }
  0x6c   :  { %1186 = vmatpush3.bf16.msra.mxu0 %v1279_v24 }
  0xef   :  { %v1085_v26 = vpop.f32.mrf.mxu0 }
  0xf0   :  { %v1107_v27 = vpop.f32.mrf.mxu1 }
  0xf1   :  { %v1086_v28 = vpop.f32.mrf.mxu0 }
  0xf2   :  { %v1108_v29 = vpop.f32.mrf.mxu1  ;;  %v1087_v31 = vadd.f32 %v1086_v28, %v1085_v26 }
  0xf3   :  { %v1088_v30 = vpop.f32.mrf.mxu0  ;;  %v1109_v36 = vadd.f32 %v1108_v29, %v1107_v27 }
  0xf4   :  { %v1110_v32 = vpop.f32.mrf.mxu1  ;;  %v643_v35 = vadd.f32 %v1087_v31, %v981_v33 }
  0xf5   :  { %v1089_v34 = vpop.f32.mrf.mxu0 }
  0xf6   :  { %v1090_v37 = vadd.f32 %v1089_v34, %v1088_v30  ;;  %v1111_v38 = vpop.f32.mrf.mxu1  ;;  %v684_v42 = vadd.f32 %v1109_v36, %v643_v35 }
  0xf7   :  { %v1112_v47 = vadd.f32 %v1111_v38, %v1110_v32 }
  0xf8   :  { %v646_v43 = vadd.f32 %v1090_v37, %v981_v33 }
  0xfa   :  { %v687_v51 = vadd.f32 %v1112_v47, %v646_v43 }
 0x10f   :  { %v1129_v39 = vpop.f32.mrf.mxu0 }
 0x110   :  { %v1151_v40 = vpop.f32.mrf.mxu1 }
 0x111   :  { %v1130_v41 = vpop.f32.mrf.mxu0 }
 0x112   :  { %v1131_v44 = vadd.f32 %v1130_v41, %v1129_v39  ;;  %v1152_v45 = vpop.f32.mrf.mxu1 }
 0x113   :  { %v1132_v46 = vpop.f32.mrf.mxu0  ;;  %v1153_v52 = vadd.f32 %v1152_v45, %v1151_v40 }
 0x114   :  { %v725_v48 = vadd.f32 %v1131_v44, %v684_v42  ;;  %v1154_v49 = vpop.f32.mrf.mxu1 }
 0x115   :  { %v1133_v50 = vpop.f32.mrf.mxu0 }
 0x116   :  { %v1134_v53 = vadd.f32 %v1133_v50, %v1132_v46  ;;  %v1155_v54 = vpop.f32.mrf.mxu1  ;;  %v766_v55 = vadd.f32 %v1153_v52, %v725_v48 }
 0x117   :  { %v1156_v57 = vadd.f32 %v1155_v54, %v1154_v49 }
 0x118   :  { %v728_v56 = vadd.f32 %v1134_v53, %v687_v51  ;;  %v772_v59 = vmax.f32 %v766_v55, 0.0 }
 0x11a   :  { %v769_v58 = vadd.f32 %v1156_v57, %v728_v56 }
 0x11c   :  { %v773_v60 = vmax.f32 %v769_v58, 0.0 }
 0x11e   :  { %v774_v61 = vpack.c.bf16 %v773_v60, %v772_v59 }
 0x120   :  { %1188 = vmatmul.mubr.bf16.vlgmr.msra.gmra.mxu0 %v774_v61 }
 0x1e0   :  { %v880_v2 = vpop.f32.mrf.mxu0 }
 0x1e1   :  { %v881_v4 = vadd.f32 %v1054_v1, %v880_v2 }
 0x1e2   :  { %v1189_v3 = vpop.f32.mrf.mxu0 }
 0x1e3   :  { %v887_v8 = vmax.f32 %v881_v4, 0.0 }
 0x1e4   :  { %v883_v5 = vpop.f32.mrf.mxu0 }
 0x1e5   :  { %v884_v6 = vadd.f32 %v1054_v1, %v883_v5 }
 0x1e6   :  { %v1190_v7 = vpop.f32.mrf.mxu0 }
 0x1e7   :  { %v888_v9 = vmax.f32 %v884_v6, 0.0 }
 0x1e9   :  { %v889_v10 = vpack.c.bf16 %v888_v9, %v887_v8 }
 0x1eb   :  { %1200 = vmatmul.mubr.msk.bf16.vlgmr.msra.gmra.mxu1 %vm929_vm1, %v889_v10 }
 0x2ab   :  { %v967_v12 = vpop.f32.mrf.mxu1 }
 0x2ac   :  { %v968_v13 = vadd.f32 %v1063_v11, %v967_v12 }
 0x2ad   :  { %v1201_v14 = vpop.f32.mrf.mxu1 }
 0x2ae   :  { %974 = vst [vmem:[%s1450_s7] sm:$0xff] %v968_v13 }
 0x2af   :  { %v970_v15 = vpop.f32.mrf.mxu1 }
 0x2b0   :  { %v971_v16 = vadd.f32 %v1063_v11, %v970_v15 }
 0x2b1   :  { %v1202_v17 = vpop.f32.mrf.mxu1 }
 0x2b2   :  { %975 = vst [vmem:[%s1450_s7 + $0x8] sm:$0xff] %v971_v16 }
 0x2b3   :  { %980 = vsyncpa [#allocation3], 1 }

</bundles_post_ra>
